<compile_context>
chip_gen: v7x
topology: tpu7x:2x2x1
jax: 0.10.0
libtpu: 0.0.40
codegen_flags: <defaults>
</compile_context>

<pallas_src>
import jax
import jax.numpy as jnp
from jax.experimental import pallas as pl
from jax.experimental.pallas import tpu as pltpu


_BLOCK_BYTES_BUDGET = 2 * 1024 * 1024      # per-array per-block VMEM budget (tiled path)
_SINGLE_BLOCK_BYTES = 2 * 1024 * 1024      # whole problem below this -> 1 grid step
_DIVISOR_MIN_BLOCK_BYTES = 512 * 1024      # accept a divisor-of-T tile if its block >= this
_VMEM_SOFT_DEFAULT = 14 * 1024 * 1024      # stay under v5e's 16 MiB default scoped VMEM


def _pos_embed_add_tile_kernel(x_ref, w_ref, o_ref):
    # x_ref / o_ref: (tile_t, C)  (batch dim squeezed by the BlockSpec)
    # w_ref:         (tile_t, C)  (same block across the inner batch loop -> resident)
    # Per-tile cast instead of a wrapper-side full-table convert.
    o_ref[...] = x_ref[...].astype(o_ref.dtype) + w_ref[...].astype(o_ref.dtype)


def _pos_embed_add_whole_kernel(x_ref, w_ref, o_ref):
    # Single grid step over a small problem.  x/o: (B, T, C); w: (T, C).
    o_ref[...] = (x_ref[...].astype(o_ref.dtype)
                  + w_ref[...].astype(o_ref.dtype)[None, :, :])


def _sublane_multiple(itemsize):
    # f32/i32 -> 8 rows per vreg, bf16/f16 -> 16, int8/fp8 -> 32 (sublane packing).
    return 8 * max(1, 4 // int(itemsize))


def _choose_tiling(T, C, itemsizes):
    """Pick (tile_t, T_pad) with tile_t | T_pad and T_pad >= T.

    Prefers a divisor-of-T tile (no padding).  If divisors are all tiny (e.g.
    T = 8 * prime) or T is not a multiple of 8, uses a near-budget tile and
    pads T up in the wrapper so blocks stay bounded on every chip.
    """
    s = _sublane_multiple(min(itemsizes))          # dtype-aware preferred multiple
    row_bytes = C * max(itemsizes)
    max_rows = max(s, (_BLOCK_BYTES_BUDGET // row_bytes) // s * s)

    if T <= max_rows:
        # Whole sequence in one t-block (full-dim exception covers any T).
        return T, T

    best = 0
    for step in (s, 8):                            # packed multiple first, hw minimum next
        if T % step:
            continue
        for cand in range(step, max_rows + 1, step):
            if T % cand == 0:
                best = max(best, cand)
        break
    if best and best * row_bytes >= _DIVISOR_MIN_BLOCK_BYTES:
        return best, T                             # good divisor tile, no padding

    # TODO(synk): switch to a cdiv grid with masked partial last tile to avoid
    # the pad/slice copies once partial-block masking is validated here.
    tile_t = max_rows
    T_pad = ((T + tile_t - 1) // tile_t) * tile_t
    return tile_t, T_pad


def position_embedding_add(x, embed_weight):
    """x: (B, T, C); embed_weight: (max_len, C).  Returns x + embed_weight[:T]."""
    B, T, C = x.shape
    max_len, C_w = embed_weight.shape
    if C_w != C:
        raise ValueError(f"hidden dim mismatch: x has C={C}, table has C={C_w}")
    if T > max_len:
        raise ValueError(f"sequence length T={T} exceeds max_len={max_len}")

    # Match torch type promotion (bf16 x + f32 table -> f32 output).
    out_dtype = jnp.promote_types(x.dtype, embed_weight.dtype)
    x_isz = jnp.dtype(x.dtype).itemsize
    w_isz = jnp.dtype(embed_weight.dtype).itemsize
    o_isz = jnp.dtype(out_dtype).itemsize

    # ---- tiny-problem fast path: one grid step, no per-step overhead --------
    if B * T * C * max(x_isz, o_isz) <= _SINGLE_BLOCK_BYTES:
        w_arr = embed_weight if (T % 8 == 0 or T == max_len) else embed_weight[:T, :]
        return pl.pallas_call(
            _pos_embed_add_whole_kernel,
            out_shape=jax.ShapeDtypeStruct((B, T, C), out_dtype),
            grid_spec=pltpu.PrefetchScalarGridSpec(
                num_scalar_prefetch=0,
                grid=(1,),
                in_specs=[
                    pl.BlockSpec((B, T, C), lambda i: (0, 0, 0)),
                    pl.BlockSpec((T, C), lambda i: (0, 0)),
                ],
                out_specs=pl.BlockSpec((B, T, C), lambda i: (0, 0, 0)),
            ),
            compiler_params=pltpu.CompilerParams(
                dimension_semantics=("arbitrary",),
            ),
        )(x, w_arr)

    # ---- general tiled path --------------------------------------------------
    tile_t, T_pad = _choose_tiling(T, C, (x_isz, w_isz, o_isz))
    num_t = T_pad // tile_t

    x_arr = x
    if T_pad != T:
        x_arr = jnp.pad(x, ((0, 0), (0, T_pad - T), (0, 0)))

    # Pass the full table whenever the block tiling rule allows it and all read
    # rows are in-bounds; otherwise slice/pad only the first T rows (no full-
    # table copy, no full-table dtype cast).
    if T_pad <= max_len and (tile_t % 8 == 0 or (tile_t == T_pad == max_len)):
        w_arr = embed_weight
    else:
        w_arr = embed_weight[:T, :]
        if T_pad != T:
            w_arr = jnp.pad(w_arr, ((0, T_pad - T), (0, 0)))

    # Double-buffered VMEM footprint; only override the scoped limit if needed
    # (e.g. very large C forcing blocks past the 2 MiB budget on v5e).
    block_elems = tile_t * C
    footprint = 2 * block_elems * (x_isz + w_isz + o_isz) + (1 << 20)
    cp_kwargs = dict(dimension_semantics=("parallel", "parallel"))
    if footprint > _VMEM_SOFT_DEFAULT:
        # TODO(synk): for pathological C this can still exceed v7x's 64 MiB
        # physical VMEM; would need C-tiling in that regime.
        cp_kwargs["vmem_limit_bytes"] = min(footprint + (4 << 20), 60 * 1024 * 1024)

    out = pl.pallas_call(
        _pos_embed_add_tile_kernel,
        out_shape=jax.ShapeDtypeStruct((B, T_pad, C), out_dtype),
        grid_spec=pltpu.PrefetchScalarGridSpec(
            num_scalar_prefetch=0,
            # Batch axis innermost: the w block index (t, 0) is constant across
            # the inner b loop, so the embedding tile is not re-DMA'd per batch.
            grid=(num_t, B),
            in_specs=[
                pl.BlockSpec((pl.Squeezed(), tile_t, C), lambda t, b: (b, t, 0)),
                pl.BlockSpec((tile_t, C), lambda t, b: (t, 0)),
            ],
            out_specs=pl.BlockSpec((pl.Squeezed(), tile_t, C), lambda t, b: (b, t, 0)),
        ),
        compiler_params=pltpu.CompilerParams(**cp_kwargs),
    )(x_arr, w_arr)

    if T_pad != T:
        out = out[:, :T, :]
    return out


if __name__ == "__main__":
    key = jax.random.PRNGKey(0)
    k1, k2, k3, k4, k5 = jax.random.split(key, 5)

    # --- small demo shapes consistent with the module: x is (B, T, C) --------
    max_len, hidden_dim = 16, 32
    B, T, C = 2, 8, hidden_dim                         # T <= max_len, C == hidden_dim
    embed_weight = jax.random.normal(k1, (max_len, hidden_dim), dtype=jnp.float32)
    x = jax.random.normal(k2, (B, T, C), dtype=jnp.float32)

    out = jax.block_until_ready(position_embedding_add(x, embed_weight))
    ref = x + embed_weight[:T, :][None, :, :]
    assert out.shape == (B, T, C) and out.dtype == jnp.float32
    assert jnp.allclose(out, ref, atol=1e-6), "mismatch (small path)"

    # --- mixed-dtype check: bf16 activations + f32 table -> f32 out (torch promotion)
    x_bf16 = x.astype(jnp.bfloat16)
    out_b = jax.block_until_ready(position_embedding_add(x_bf16, embed_weight))
    ref_b = x_bf16.astype(jnp.float32) + embed_weight[:T, :][None, :, :]
    assert out_b.dtype == jnp.float32
    assert jnp.allclose(out_b, ref_b, atol=1e-6), "mismatch (bf16 promotion path)"

    # --- larger check exercising the tiled grid=(num_t, B) path --------------
    max_len2, hid2 = 3072, 512
    B2, T2 = 2, 2048
    embed_weight2 = jax.random.normal(k3, (max_len2, hid2), dtype=jnp.float32)
    x2 = jax.random.normal(k4, (B2, T2, hid2), dtype=jnp.float32)
    out2 = jax.block_until_ready(position_embedding_add(x2, embed_weight2))
    ref2 = x2 + embed_weight2[:T2, :][None, :, :]
    assert out2.shape == (B2, T2, hid2)
    assert jnp.allclose(out2, ref2, atol=1e-6), "mismatch (tiled path)"

    # --- awkward T (= 8 * prime) exercising the bounded pad-and-slice path ----
    max_len3, hid3 = 2048, 512
    B3, T3 = 2, 2008                                   # 2008 = 8 * 251
    x3 = jax.random.normal(k5, (B3, T3, hid3), dtype=jnp.float32)
    embed_weight3 = embed_weight2[:max_len3, :hid3]
    out3 = jax.block_until_ready(position_embedding_add(x3, embed_weight3))
    ref3 = x3 + embed_weight3[:T3, :][None, :, :]
    assert out3.shape == (B3, T3, hid3)
    assert jnp.allclose(out3, ref3, atol=1e-6), "mismatch (padded path)"

    print("KERNEL_OK")
</pallas_src>

<mosaic_0001>
module attributes {stable_mosaic.version = 11 : i64} {
  func.func @_pos_embed_add_whole_kernel(%arg0: i32, %arg1: memref<2x8x32xf32, #tpu.memory_space<vmem>>, %arg2: memref<8x32xf32, #tpu.memory_space<vmem>>, %arg3: memref<2x8x32xf32, #tpu.memory_space<vmem>>) attributes {dimension_semantics = [#tpu.dimension_semantics<arbitrary>], iteration_bounds = array<i64: 1>, scalar_prefetch = 0 : i64, scratch_operands = 0 : i64, tpu.core_type = #tpu.core_type<tc>, window_params = [{pipeline_mode = #tpu.pipeline_mode<synchronous>, transform_indices = @transform_0, window_bounds = array<i64: 2, 8, 32>}, {transform_indices = @transform_1, window_bounds = array<i64: 8, 32>}, {pipeline_mode = #tpu.pipeline_mode<synchronous>, transform_indices = @transform_2, window_bounds = array<i64: 2, 8, 32>}]} {
    %c0 = arith.constant 0 : index
    %c0_0 = arith.constant 0 : index
    %c0_1 = arith.constant 0 : index
    %0 = vector.load %arg1[%c0, %c0_0, %c0_1] : memref<2x8x32xf32, #tpu.memory_space<vmem>>, vector<2x8x32xf32>
    %c0_2 = arith.constant 0 : index
    %c0_3 = arith.constant 0 : index
    %1 = vector.load %arg2[%c0_2, %c0_3] : memref<8x32xf32, #tpu.memory_space<vmem>>, vector<8x32xf32>
    %2 = vector.shape_cast %1 : vector<8x32xf32> to vector<1x8x32xf32>
    %3 = vector.broadcast %2 : vector<1x8x32xf32> to vector<2x8x32xf32>
    %4 = arith.addf %0, %3 : vector<2x8x32xf32>
    %c0_4 = arith.constant 0 : index
    %c0_5 = arith.constant 0 : index
    %c0_6 = arith.constant 0 : index
    %5 = vector.load %arg3[%c0_4, %c0_5, %c0_6] : memref<2x8x32xf32, #tpu.memory_space<vmem>>, vector<2x8x32xf32>
    tpu.vector_store %arg3[%c0_4, %c0_5, %c0_6], %4 {strides = array<i32>} : memref<2x8x32xf32, #tpu.memory_space<vmem>>, vector<2x8x32xf32>,
    return
  }
  func.func @transform_0(%arg0: i32) -> (i32, i32, i32) {
    %c0_i32 = arith.constant 0 : i32
    %c0_i32_0 = arith.constant 0 : i32
    %c0_i32_1 = arith.constant 0 : i32
    %c0_i32_2 = arith.constant 0 : i32
    return %c0_i32, %c0_i32_0, %c0_i32_1 : i32, i32, i32
  }
  func.func @transform_1(%arg0: i32) -> (i32, i32) {
    %c0_i32 = arith.constant 0 : i32
    %c0_i32_0 = arith.constant 0 : i32
    %c0_i32_1 = arith.constant 0 : i32
    return %c0_i32, %c0_i32_0 : i32, i32
  }
  func.func @transform_2(%arg0: i32) -> (i32, i32, i32) {
    %c0_i32 = arith.constant 0 : i32
    %c0_i32_0 = arith.constant 0 : i32
    %c0_i32_1 = arith.constant 0 : i32
    %c0_i32_2 = arith.constant 0 : i32
    return %c0_i32, %c0_i32_0, %c0_i32_1 : i32, i32, i32
  }
}

</mosaic_0001>

<bundles_post_ra>
// kernel: tpu_custom_call.1
= control target key start
LH: loop header
LB: loop body
LE: loop exit
PB: predicated region body
PF: predicated region fallthrough
CT: control target
= control target key end

     0   :  { %7 = vsyncpa [#allocation3], 0  ;;  %s206_s0 = inlined_call_operand.hbm [shape: f32[2,8,32], index: 0, kind: input, shape index: {}]   ;;  %s207_s1 = inlined_call_operand.hbm [shape: f32[16,32], index: 1, kind: input, shape index: {}]   ;;  %s208_s2 = inlined_call_operand.hbm [shape: f32[2,8,32], index: 2, kind: output, shape index: {}]  }
   0x1   :  { %8 = vsyncpa [#allocation6], 0 }
   0x2   :  { %9 = vsyncpa [#allocation4], 0  ;;  %s141_s9 = smov [#allocation2]   ;;  %s69_s13 = scalar_lea.hbm %s206_s0, 256 }
   0x3   :  { %s15_s10 = sshll.u32 %s141_s9, 4  ;;  %p70_p0 = scmp.ne.s32.totalorder %s206_s0, %s69_s13  ;;  %s16_s10 = int_to_ptr.vmem [resolvable:$true] %s15_s10 }
   0x4   :  { %p73_p1 = scmp.lt.u32.totalorder %s69_s13, %s206_s0 }
   0x6   :  { %p75_p2 = pnand %p73_p1, %p70_p0 }
   0x8   :  { %78 = shalt.err (!%p75_p2)
}
   0x9   :  { %s79_s18 = scalar_lea.vmem %s16_s10, 256  ;;  %p84_p4 = scmp.lt.s32.totalorder %s16_s10, %s16_s10 }
   0xa   :  { %p80_p3 = scmp.ne.s32.totalorder %s16_s10, %s79_s18  ;;  %p85_p5 = scmp.lt.s32.totalorder %s79_s18, %s79_s18 }
   0xc   :  { %p86_p6 = por %p85_p5, %p84_p4 }
   0xe   :  { %p87_p7 = pnand %p86_p6, %p80_p3 }
  0x10   :  { %90 = shalt.err (!%p87_p7)
}
  0x11   :  { %s142_s19 = smov 128   ;;  %s143_s20 = smov 8  }
  0x12   :  { %21 = dma.hbm_to_vmem [thread:$0]  %s206_s0, 256, %s16_s10, [#allocation3], %s142_s19, %s142_s19, %s143_s20  }
  0x13   :  { %s144_s23 = smov [#allocation5]   ;;  %s91_s27 = scalar_lea.hbm %s207_s1, 128 }
  0x14   :  { %s28_s24 = sshll.u32 %s144_s23, 4  ;;  %p92_p8 = scmp.ne.s32.totalorder %s207_s1, %s91_s27  ;;  %s29_s24 = int_to_ptr.vmem [resolvable:$true] %s28_s24 }
  0x15   :  { %s93_s4 = scalar_lea.hbm %s207_s1, 256  ;;  %p95_p10 = scmp.lt.u32.totalorder %s91_s27, %s207_s1 }
  0x16   :  { %p94_p9 = scmp.lt.u32.totalorder %s93_s4, %s91_s27 }
  0x18   :  { %p96_p11 = por %p95_p10, %p94_p9 }
  0x1a   :  { %p97_p12 = pnand %p96_p11, %p92_p8 }
  0x1c   :  { %100 = shalt.err (!%p97_p12)
}
  0x1d   :  { %s101_s0 = scalar_lea.vmem %s29_s24, 128  ;;  %p106_p0 = scmp.lt.s32.totalorder %s29_s24, %s29_s24 }
  0x1e   :  { %p102_p13 = scmp.ne.s32.totalorder %s29_s24, %s101_s0  ;;  %p107_p1 = scmp.lt.s32.totalorder %s101_s0, %s101_s0 }
  0x20   :  { %p108_p2 = por %p107_p1, %p106_p0 }
  0x22   :  { %p109_p3 = pnand %p108_p2, %p102_p13 }
  0x24   :  { %112 = shalt.err (!%p109_p3)
}
  0x25   :  { %31 = dma.hbm_to_vmem [thread:$0]  %s207_s1, 128, %s29_s24, [#allocation6]  }
  0x26   :  { %135 = dma.done.wait [#allocation3], 256  }
  0x27   :  { %136 = vsyncadd [#allocation3], 4294967040 }
  0x28   :  { %137 = dma.done.wait [#allocation6], 128  }
  0x29   :  { %138 = vsyncadd [#allocation6], 4294967168  ;;  %s145_s9 = smov [#allocation7]   ;;  %v38_v0 = vld [vmem:[#allocation2] sm:$0xff]  ;;  %v40_v1 = vld [vmem:[#allocation5] sm:$0xff]  ;;  %vm43_vm0 = vcmask 261120  }
  0x2a   :  { %s51_s10 = sshll.u32 %s145_s9, 4  ;;  %v39_v2 = vld [vmem:[#allocation2 + $0x8] sm:$0xff]  ;;  %v41_v3 = vadd.f32 %v40_v1, %v38_v0  ;;  %s52_s10 = int_to_ptr.vmem [resolvable:$true] %s51_s10 }
  0x2b   :  { %v42_v4 = vadd.f32 %v40_v1, %v39_v2  ;;  %s113_s11 = scalar_lea.vmem %s52_s10, 256  ;;  %p118_p5 = scmp.lt.s32.totalorder %s52_s10, %s52_s10 }
  0x2c   :  { %44 = vst.msk [vmem:[#allocation7] sm:$0xff] %vm43_vm0, %v41_v3  ;;  %p114_p4 = scmp.ne.s32.totalorder %s52_s10, %s113_s11  ;;  %p119_p6 = scmp.lt.s32.totalorder %s113_s11, %s113_s11 }
  0x2d   :  { %45 = vst.msk [vmem:[#allocation7 + $0x8] sm:$0xff] %vm43_vm0, %v42_v4 }
  0x2e   :  { %p120_p7 = por %p119_p6, %p118_p5 }
  0x30   :  { %p121_p8 = pnand %p120_p7, %p114_p4 }
  0x32   :  { %124 = shalt.err (!%p121_p8)
}
  0x33   :  { %s125_s13 = scalar_lea.hbm %s208_s2, 256 }
  0x34   :  { %p126_p9 = scmp.ne.s32.totalorder %s208_s2, %s125_s13  ;;  %p129_p10 = scmp.lt.u32.totalorder %s125_s13, %s208_s2 }
  0x36   :  { %p131_p11 = pnand %p129_p10, %p126_p9 }
  0x38   :  { %134 = shalt.err (!%p131_p11)
}
  0x39   :  { %57 = dma.vmem_to_hbm [thread:$0]  %s52_s10, 256, %s208_s2, [#allocation4], %s142_s19, %s142_s19, %s143_s20  }
  0x3a   :  { %139 = dma.done.wait [#allocation4], 256  }
  0x3b   :  { %140 = vsyncadd [#allocation4], 4294967040 }
  0x3c   :  { %61 = vsyncpa [#allocation3], 1 }
  0x3d   :  { %62 = vsyncpa [#allocation6], 1 }
  0x3e   :  { %63 = vsyncpa [#allocation4], 1 }

</bundles_post_ra>
